<compile_context>
chip_gen: v5e
topology: v5e:2x2
jax: 0.10.0
libtpu: 0.0.40
codegen_flags: <defaults>
</compile_context>

<pallas_src>
import functools

import jax
import jax.numpy as jnp
from jax import lax
from jax.experimental import pallas as pl
from jax.experimental.pallas import tpu as pltpu

EXPANSION = 4


def bottleneck_kernel(x_ref, w1_ref, w2u_ref, w2c_ref, w2d_ref, w3_ref,
                      b1_ref, b2_ref, b3_ref, out_ref, *, img_h):
    """One row-tile (whole images worth of flattened (n, h) rows).

    Lane-dense layouts (last dim = W * channels):
      x_ref    (T, W*Cin)   f32   T = k*img_h flattened rows
      w1_ref   (W*Cin, W*P) bf16  conv1 1x1, BN1 folded, kron(I_W, w1)
      w2*_ref  (W*P, W*P)   bf16  conv2 ky in {-1,0,+1} band-kron weights
      w3_ref   (W*P, W*C3)  bf16  conv3 1x1, BN3 folded, kron(I_W, w3)
      b*_ref   (1, W*Cout)  f32   folded BN biases, tiled over W
      out_ref  (T, W*C3)    bf16
    """
    x = x_ref[...]                                        # (T, WC) f32
    t = x.shape[0]

    # ---- conv1 (1x1) + folded BN1 + ReLU (bf16 MXU operands, f32 acc) ----
    h1 = jnp.dot(x.astype(jnp.bfloat16), w1_ref[...],
                 preferred_element_type=jnp.float32)
    h1 = jnp.maximum(h1 + b1_ref[...], 0.0)               # (T, W*P) f32

    # ---- conv2 (3x3, stride 1, pad 1) + folded BN2 + ReLU ----
    # Vertical taps via XLU sublane rotations (free slot while MXU works).
    # The tile holds whole images, so rolled-wraparound rows coincide exactly
    # with rows that must read conv2's zero padding and are masked below.
    h1_up = pltpu.roll(h1, shift=1, axis=0)               # row r -> h1[r-1]
    h1_dn = pltpu.roll(h1, shift=t - 1, axis=0)           # row r -> h1[r+1]
    h_in_img = lax.broadcasted_iota(jnp.int32, h1.shape, 0) % img_h
    h1_up = jnp.where(h_in_img == 0, 0.0, h1_up)          # zero-pad above image
    h1_dn = jnp.where(h_in_img == img_h - 1, 0.0, h1_dn)  # zero-pad below image

    # Three accumulating MXU dots (dx shifts / W zero-padding are folded into
    # the band-kron weights), replacing the old lane-axis concatenate.
    h2 = jnp.dot(h1_up.astype(jnp.bfloat16), w2u_ref[...],
                 preferred_element_type=jnp.float32)
    h2 = h2 + jnp.dot(h1.astype(jnp.bfloat16), w2c_ref[...],
                      preferred_element_type=jnp.float32)
    h2 = h2 + jnp.dot(h1_dn.astype(jnp.bfloat16), w2d_ref[...],
                      preferred_element_type=jnp.float32)
    h2 = jnp.maximum(h2 + b2_ref[...], 0.0)                # (T, W*P) f32

    # ---- conv3 (1x1) + folded BN3 + identity residual + ReLU ----
    h3 = jnp.dot(h2.astype(jnp.bfloat16), w3_ref[...],
                 preferred_element_type=jnp.float32)
    out = jnp.maximum(h3 + b3_ref[...] + x, 0.0)           # (T, W*C3) f32
    out_ref[...] = out.astype(out_ref.dtype)               # store bf16


def _pick_tile_rows(n, h, target_rows=256):
    """Rows per grid step: k whole images per tile (k | n, k*h % 8 == 0),
    as large as possible up to `target_rows` while keeping >=2 grid steps
    (so both v7x TensorCores get work)."""
    valid = [k for k in range(1, n + 1) if n % k == 0 and (k * h) % 8 == 0]
    assert valid, "need k*H to be a multiple of 8 for some k dividing N"
    preferred = [k for k in valid if k * h <= target_rows and (n // k) >= 2]
    k = max(preferred) if preferred else min(valid)
    return k * h


def bottleneck_forward_nhwc(x_nhwc, kparams, *, target_rows=256):
    """Fused Bottleneck forward. x_nhwc: (N, H, W, Cin) f32 -> NHWC bf16."""
    w1k, w2u, w2c, w2d, w3k, b1t, b2t, b3t = kparams
    N, H, W, Cin = x_nhwc.shape
    WC = W * Cin
    WC3 = w3k.shape[1]
    assert WC3 == WC, "downsample=None requires inplanes == planes*expansion"

    tile_rows = _pick_tile_rows(N, H, target_rows)
    total_rows = N * H
    num_tiles = total_rows // tile_rows

    # Flatten (N, H) into one big-M row axis; lane-dense (W*C) last dim.
    x2 = x_nhwc.reshape(total_rows, WC)

    def const(shape):
        return pl.BlockSpec(shape, lambda i: (0,) * len(shape))

    kernel = functools.partial(bottleneck_kernel, img_h=H)
    out2 = pl.pallas_call(
        kernel,
        grid=(num_tiles,),
        in_specs=[
            pl.BlockSpec((tile_rows, WC), lambda i: (i, 0)),
            const(w1k.shape), const(w2u.shape), const(w2c.shape),
            const(w2d.shape), const(w3k.shape),
            const(b1t.shape), const(b2t.shape), const(b3t.shape),
        ],
        out_specs=pl.BlockSpec((tile_rows, WC3), lambda i: (i, 0)),
        out_shape=jax.ShapeDtypeStruct((total_rows, WC3), jnp.bfloat16),
        compiler_params=pltpu.CompilerParams(
            dimension_semantics=("parallel",),
            # Sized against v7x's 64 MiB VMEM; far below it at these shapes.
            vmem_limit_bytes=48 * 1024 * 1024),
    )(x2, w1k, w2u, w2c, w2d, w3k, b1t, b2t, b3t)
    return out2.reshape(N, H, W, WC3 // W)


def bottleneck_forward(x_nchw, kparams, *, target_rows=256):
    """NCHW wrapper matching the PyTorch module API (output is bf16)."""
    # TODO(synk): in a full network keep activations NHWC (and bf16) end-to-end
    # and drop these transposes; kept here only to match the NCHW interface.
    x = jnp.transpose(x_nchw, (0, 2, 3, 1))
    y = bottleneck_forward_nhwc(x, kparams, target_rows=target_rows)
    return jnp.transpose(y, (0, 3, 1, 2))


def make_params(key, inplanes, planes, expansion=EXPANSION):
    """Conv weights (channels-last layout) + SyncBatchNorm stats (eval mode)."""
    P, C3 = planes, planes * expansion
    ks = jax.random.split(key, 15)
    w1 = 0.1 * jax.random.normal(ks[0], (inplanes, P), jnp.float32)   # (Cin,Cout)
    w2 = 0.1 * jax.random.normal(ks[1], (3, 3, P, P), jnp.float32)    # HWIO
    w3 = 0.1 * jax.random.normal(ks[2], (P, C3), jnp.float32)

    def bn(kg, kb, km, kv, c):
        return (1.0 + 0.1 * jax.random.normal(kg, (c,), jnp.float32),     # gamma
                0.1 * jax.random.normal(kb, (c,), jnp.float32),           # beta
                0.1 * jax.random.normal(km, (c,), jnp.float32),           # mean
                jnp.abs(jax.random.normal(kv, (c,), jnp.float32)) + 0.5)  # var

    return dict(w1=w1, w2=w2, w3=w3,
                bn1=bn(*ks[3:7], P), bn2=bn(*ks[7:11], P), bn3=bn(*ks[11:15], C3))


def fold_bn(params, eps=1e-5):
    """Fold eval-mode SyncBatchNorm into the conv weights + an additive bias.
    # TODO(synk): training-mode SyncBatchNorm (cross-replica batch statistics)
    # is not reproduced; only the eval-mode affine form is implemented."""
    def fold(w, stats):
        gamma, beta, mean, var = stats
        scale = gamma / jnp.sqrt(var + eps)
        return w * scale, beta - mean * scale   # scale broadcasts over Cout
    w1f, b1 = fold(params["w1"], params["bn1"])
    w2f, b2 = fold(params["w2"], params["bn2"])
    w3f, b3 = fold(params["w3"], params["bn3"])
    return (w1f, w2f, w3f, b1, b2, b3)


def build_kernel_params(folded, W):
    """Expand folded weights to the lane-dense (W-interleaved) layout:
    1x1 convs -> kron(I_W, w); the 3x3 conv -> three (W*P, W*P) band matrices
    (one per ky) that fold the dx shifts and W zero-padding.
    # TODO(synk): the kron layout is a small-channel special case (it inflates
    # K by ~W and scales as W^2*Cin*P); for realistic ResNet widths switch to a
    # plain (N*H*W, C) layout with accumulating 1x1 matmul taps instead."""
    w1f, w2f, w3f, b1, b2, b3 = folded
    eye = jnp.eye(W, dtype=jnp.float32)
    w1k = jnp.kron(eye, w1f)                               # (W*Cin, W*P)
    w3k = jnp.kron(eye, w3f)                               # (W*P,  W*C3)
    w2_parts = []
    for dy in range(3):
        m = sum(jnp.kron(jnp.eye(W, k=1 - dx, dtype=jnp.float32), w2f[dy, dx])
                for dx in range(3))
        w2_parts.append(m.astype(jnp.bfloat16))            # (W*P, W*P) banded
    return (w1k.astype(jnp.bfloat16),
            w2_parts[0], w2_parts[1], w2_parts[2],
            w3k.astype(jnp.bfloat16),
            jnp.tile(b1, W)[None, :], jnp.tile(b2, W)[None, :],
            jnp.tile(b3, W)[None, :])


def reference_forward(x_nchw, folded):
    """Pure-JAX/XLA reference with matching numerics (bf16 matmul operands,
    f32 accumulation and f32 elementwise math)."""
    w1f, w2f, w3f, b1, b2, b3 = folded
    bf = jnp.bfloat16
    x = jnp.transpose(x_nchw, (0, 2, 3, 1))                # NHWC f32
    h1 = jnp.einsum('nhwc,cp->nhwp', x.astype(bf), w1f.astype(bf),
                    preferred_element_type=jnp.float32)
    h1 = jnp.maximum(h1 + b1, 0.0)
    h2 = lax.conv_general_dilated(
        h1.astype(bf), w2f.astype(bf), window_strides=(1, 1), padding='SAME',
        dimension_numbers=('NHWC', 'HWIO', 'NHWC'),
        preferred_element_type=jnp.float32)
    h2 = jnp.maximum(h2 + b2, 0.0)
    h3 = jnp.einsum('nhwp,pc->nhwc', h2.astype(bf), w3f.astype(bf),
                    preferred_element_type=jnp.float32)
    out = jnp.maximum(h3 + b3 + x, 0.0)
    return jnp.transpose(out, (0, 3, 1, 2))


if __name__ == "__main__":
    key = jax.random.PRNGKey(0)
    kx, kp = jax.random.split(key)

    # Bottleneck(inplanes=16, planes=4, stride=1, downsample=None)
    inplanes, planes = 16, 4
    N, H, W = 2, 16, 16

    x = jax.random.normal(kx, (N, inplanes, H, W), jnp.float32)   # NCHW input
    params = make_params(kp, inplanes, planes)
    folded = fold_bn(params)
    kparams = build_kernel_params(folded, W)

    out = jax.block_until_ready(jax.jit(bottleneck_forward)(x, kparams))
    assert out.shape == (N, planes * EXPANSION, H, W)
    assert out.dtype == jnp.bfloat16

    ref = reference_forward(x, folded).astype(jnp.bfloat16)
    o32, r32 = out.astype(jnp.float32), ref.astype(jnp.float32)
    err = float(jnp.max(jnp.abs(o32 - r32)))
    assert jnp.allclose(o32, r32, rtol=2e-2, atol=2e-2), f"max abs err {err}"
    print("KERNEL_OK")
</pallas_src>

<mosaic_0001>
module attributes {stable_mosaic.version = 11 : i64} {
  func.func @bottleneck_kernel(%arg0: i32, %arg1: memref<16x256xf32, #tpu.memory_space<vmem>>, %arg2: memref<256x64xbf16, #tpu.memory_space<vmem>>, %arg3: memref<64x64xbf16, #tpu.memory_space<vmem>>, %arg4: memref<64x64xbf16, #tpu.memory_space<vmem>>, %arg5: memref<64x64xbf16, #tpu.memory_space<vmem>>, %arg6: memref<64x256xbf16, #tpu.memory_space<vmem>>, %arg7: memref<1x64xf32, #tpu.memory_space<vmem>>, %arg8: memref<1x64xf32, #tpu.memory_space<vmem>>, %arg9: memref<1x256xf32, #tpu.memory_space<vmem>>, %arg10: memref<16x256xbf16, #tpu.memory_space<vmem>>) attributes {dimension_semantics = [#tpu.dimension_semantics<parallel>], iteration_bounds = array<i64: 2>, scalar_prefetch = 0 : i64, scratch_operands = 0 : i64, tpu.core_type = #tpu.core_type<tc>, window_params = [{transform_indices = @transform_0, window_bounds = array<i64: 16, 256>}, {pipeline_mode = #tpu.pipeline_mode<synchronous>, transform_indices = @transform_1, window_bounds = array<i64: 256, 64>}, {pipeline_mode = #tpu.pipeline_mode<synchronous>, transform_indices = @transform_2, window_bounds = array<i64: 64, 64>}, {pipeline_mode = #tpu.pipeline_mode<synchronous>, transform_indices = @transform_3, window_bounds = array<i64: 64, 64>}, {pipeline_mode = #tpu.pipeline_mode<synchronous>, transform_indices = @transform_4, window_bounds = array<i64: 64, 64>}, {pipeline_mode = #tpu.pipeline_mode<synchronous>, transform_indices = @transform_5, window_bounds = array<i64: 64, 256>}, {pipeline_mode = #tpu.pipeline_mode<synchronous>, transform_indices = @transform_6, window_bounds = array<i64: 1, 64>}, {pipeline_mode = #tpu.pipeline_mode<synchronous>, transform_indices = @transform_7, window_bounds = array<i64: 1, 64>}, {pipeline_mode = #tpu.pipeline_mode<synchronous>, transform_indices = @transform_8, window_bounds = array<i64: 1, 256>}, {transform_indices = @transform_9, window_bounds = array<i64: 16, 256>}]} {
    %c0 = arith.constant 0 : index
    %c0_0 = arith.constant 0 : index
    %0 = vector.load %arg1[%c0, %c0_0] : memref<16x256xf32, #tpu.memory_space<vmem>>, vector<16x256xf32>
    %1 = arith.truncf %0 : vector<16x256xf32> to vector<16x256xbf16>
    %c0_1 = arith.constant 0 : index
    %c0_2 = arith.constant 0 : index
    %2 = vector.load %arg2[%c0_1, %c0_2] : memref<256x64xbf16, #tpu.memory_space<vmem>>, vector<256x64xbf16>
    %cst = arith.constant dense<0.000000e+00> : vector<16x64xf32>
    %3 = tpu.matmul %1, %2, %cst {dimension_numbers = #tpu.dot_dimension_numbers<[1], [0], [0], [1], [0, 0, 1, 1], [], []>} : vector<16x256xbf16>, vector<256x64xbf16>, vector<16x64xf32> -> vector<16x64xf32>
    %c0_3 = arith.constant 0 : index
    %c0_4 = arith.constant 0 : index
    %4 = vector.load %arg7[%c0_3, %c0_4] : memref<1x64xf32, #tpu.memory_space<vmem>>, vector<1x64xf32>
    %5 = vector.broadcast %4 : vector<1x64xf32> to vector<16x64xf32>
    %6 = arith.addf %3, %5 : vector<16x64xf32>
    %cst_5 = arith.constant 0.000000e+00 : f32
    %7 = vector.broadcast %cst_5 : f32 to vector<16x64xf32>
    %8 = arith.maximumf %6, %7 : vector<16x64xf32>
    %c1_i32 = arith.constant 1 : i32
    %9 = tpu.dynamic_rotate %8 by %c1_i32 dim 0 : vector<16x64xf32>, i32 -> vector<16x64xf32>
    %c15_i32 = arith.constant 15 : i32
    %10 = tpu.dynamic_rotate %8 by %c15_i32 dim 0 : vector<16x64xf32>, i32 -> vector<16x64xf32>
    %11 = tpu.iota {dimensions = array<i32: 0>} : vector<16x64xi32>
    %c16_i32 = arith.constant 16 : i32
    %c0_i32 = arith.constant 0 : i32
    %12 = arith.cmpi eq, %c16_i32, %c0_i32 : i32
    %c1_i32_6 = arith.constant 1 : i32
    %13 = arith.select %12, %c1_i32_6, %c16_i32 : i32
    %14 = vector.broadcast %13 : i32 to vector<16x64xi32>
    %15 = arith.remsi %11, %14 : vector<16x64xi32>
    %c0_i32_7 = arith.constant 0 : i32
    %16 = vector.broadcast %c0_i32_7 : i32 to vector<16x64xi32>
    %17 = arith.cmpi ne, %15, %16 : vector<16x64xi32>
    %c0_i32_8 = arith.constant 0 : i32
    %18 = vector.broadcast %c0_i32_8 : i32 to vector<16x64xi32>
    %19 = arith.cmpi slt, %15, %18 : vector<16x64xi32>
    %c0_i32_9 = arith.constant 0 : i32
    %20 = arith.cmpi slt, %13, %c0_i32_9 : i32
    %21 = vector.broadcast %20 : i1 to vector<16x64xi1>
    %22 = vector.broadcast %21 : vector<16x64xi1> to vector<16x64xi1>
    %23 = arith.xori %19, %22 : vector<16x64xi1>
    %24 = arith.andi %23, %17 : vector<16x64xi1>
    %25 = vector.broadcast %13 : i32 to vector<16x64xi32>
    %26 = arith.addi %15, %25 : vector<16x64xi32>
    %27 = arith.select %24, %26, %15 : vector<16x64xi1>, vector<16x64xi32>
    %c0_i32_10 = arith.constant 0 : i32
    %28 = vector.broadcast %c0_i32_10 : i32 to vector<16x64xi32>
    %29 = arith.cmpi eq, %27, %28 : vector<16x64xi32>
    %cst_11 = arith.constant 0.000000e+00 : f32
    %30 = vector.broadcast %cst_11 : f32 to vector<16x64xf32>
    %31 = arith.select %29, %30, %9 : vector<16x64xi1>, vector<16x64xf32>
    %c15_i32_12 = arith.constant 15 : i32
    %32 = vector.broadcast %c15_i32_12 : i32 to vector<16x64xi32>
    %33 = arith.cmpi eq, %27, %32 : vector<16x64xi32>
    %cst_13 = arith.constant 0.000000e+00 : f32
    %34 = vector.broadcast %cst_13 : f32 to vector<16x64xf32>
    %35 = arith.select %33, %34, %10 : vector<16x64xi1>, vector<16x64xf32>
    %36 = arith.truncf %31 : vector<16x64xf32> to vector<16x64xbf16>
    %c0_14 = arith.constant 0 : index
    %c0_15 = arith.constant 0 : index
    %37 = vector.load %arg3[%c0_14, %c0_15] : memref<64x64xbf16, #tpu.memory_space<vmem>>, vector<64x64xbf16>
    %cst_16 = arith.constant dense<0.000000e+00> : vector<16x64xf32>
    %38 = tpu.matmul %36, %37, %cst_16 {dimension_numbers = #tpu.dot_dimension_numbers<[1], [0], [0], [1], [0, 0, 1, 1], [], []>} : vector<16x64xbf16>, vector<64x64xbf16>, vector<16x64xf32> -> vector<16x64xf32>
    %39 = arith.truncf %8 : vector<16x64xf32> to vector<16x64xbf16>
    %c0_17 = arith.constant 0 : index
    %c0_18 = arith.constant 0 : index
    %40 = vector.load %arg4[%c0_17, %c0_18] : memref<64x64xbf16, #tpu.memory_space<vmem>>, vector<64x64xbf16>
    %cst_19 = arith.constant dense<0.000000e+00> : vector<16x64xf32>
    %41 = tpu.matmul %39, %40, %cst_19 {dimension_numbers = #tpu.dot_dimension_numbers<[1], [0], [0], [1], [0, 0, 1, 1], [], []>} : vector<16x64xbf16>, vector<64x64xbf16>, vector<16x64xf32> -> vector<16x64xf32>
    %42 = arith.addf %38, %41 : vector<16x64xf32>
    %43 = arith.truncf %35 : vector<16x64xf32> to vector<16x64xbf16>
    %c0_20 = arith.constant 0 : index
    %c0_21 = arith.constant 0 : index
    %44 = vector.load %arg5[%c0_20, %c0_21] : memref<64x64xbf16, #tpu.memory_space<vmem>>, vector<64x64xbf16>
    %cst_22 = arith.constant dense<0.000000e+00> : vector<16x64xf32>
    %45 = tpu.matmul %43, %44, %cst_22 {dimension_numbers = #tpu.dot_dimension_numbers<[1], [0], [0], [1], [0, 0, 1, 1], [], []>} : vector<16x64xbf16>, vector<64x64xbf16>, vector<16x64xf32> -> vector<16x64xf32>
    %46 = arith.addf %42, %45 : vector<16x64xf32>
    %c0_23 = arith.constant 0 : index
    %c0_24 = arith.constant 0 : index
    %47 = vector.load %arg8[%c0_23, %c0_24] : memref<1x64xf32, #tpu.memory_space<vmem>>, vector<1x64xf32>
    %48 = vector.broadcast %47 : vector<1x64xf32> to vector<16x64xf32>
    %49 = arith.addf %46, %48 : vector<16x64xf32>
    %cst_25 = arith.constant 0.000000e+00 : f32
    %50 = vector.broadcast %cst_25 : f32 to vector<16x64xf32>
    %51 = arith.maximumf %49, %50 : vector<16x64xf32>
    %52 = arith.truncf %51 : vector<16x64xf32> to vector<16x64xbf16>
    %c0_26 = arith.constant 0 : index
    %c0_27 = arith.constant 0 : index
    %53 = vector.load %arg6[%c0_26, %c0_27] : memref<64x256xbf16, #tpu.memory_space<vmem>>, vector<64x256xbf16>
    %cst_28 = arith.constant dense<0.000000e+00> : vector<16x256xf32>
    %54 = tpu.matmul %52, %53, %cst_28 {dimension_numbers = #tpu.dot_dimension_numbers<[1], [0], [0], [1], [0, 0, 1, 1], [], []>} : vector<16x64xbf16>, vector<64x256xbf16>, vector<16x256xf32> -> vector<16x256xf32>
    %c0_29 = arith.constant 0 : index
    %c0_30 = arith.constant 0 : index
    %55 = vector.load %arg9[%c0_29, %c0_30] : memref<1x256xf32, #tpu.memory_space<vmem>>, vector<1x256xf32>
    %56 = vector.broadcast %55 : vector<1x256xf32> to vector<16x256xf32>
    %57 = arith.addf %54, %56 : vector<16x256xf32>
    %58 = arith.addf %57, %0 : vector<16x256xf32>
    %cst_31 = arith.constant 0.000000e+00 : f32
    %59 = vector.broadcast %cst_31 : f32 to vector<16x256xf32>
    %60 = arith.maximumf %58, %59 : vector<16x256xf32>
    %61 = arith.truncf %60 : vector<16x256xf32> to vector<16x256xbf16>
    %c0_32 = arith.constant 0 : index
    %c0_33 = arith.constant 0 : index
    %62 = vector.load %arg10[%c0_32, %c0_33] : memref<16x256xbf16, #tpu.memory_space<vmem>>, vector<16x256xbf16>
    tpu.vector_store %arg10[%c0_32, %c0_33], %61 {strides = array<i32>} : memref<16x256xbf16, #tpu.memory_space<vmem>>, vector<16x256xbf16>,
    return
  }
  func.func @transform_0(%arg0: i32) -> (i32, i32) {
    %c0_i32 = arith.constant 0 : i32
    %c0_i32_0 = arith.constant 0 : i32
    return %arg0, %c0_i32 : i32, i32
  }
  func.func @transform_1(%arg0: i32) -> (i32, i32) {
    %c0_i32 = arith.constant 0 : i32
    %c0_i32_0 = arith.constant 0 : i32
    %c0_i32_1 = arith.constant 0 : i32
    return %c0_i32, %c0_i32_0 : i32, i32
  }
  func.func @transform_2(%arg0: i32) -> (i32, i32) {
    %c0_i32 = arith.constant 0 : i32
    %c0_i32_0 = arith.constant 0 : i32
    %c0_i32_1 = arith.constant 0 : i32
    return %c0_i32, %c0_i32_0 : i32, i32
  }
  func.func @transform_3(%arg0: i32) -> (i32, i32) {
    %c0_i32 = arith.constant 0 : i32
    %c0_i32_0 = arith.constant 0 : i32
    %c0_i32_1 = arith.constant 0 : i32
    return %c0_i32, %c0_i32_0 : i32, i32
  }
  func.func @transform_4(%arg0: i32) -> (i32, i32) {
    %c0_i32 = arith.constant 0 : i32
    %c0_i32_0 = arith.constant 0 : i32
    %c0_i32_1 = arith.constant 0 : i32
    return %c0_i32, %c0_i32_0 : i32, i32
  }
  func.func @transform_5(%arg0: i32) -> (i32, i32) {
    %c0_i32 = arith.constant 0 : i32
    %c0_i32_0 = arith.constant 0 : i32
    %c0_i32_1 = arith.constant 0 : i32
    return %c0_i32, %c0_i32_0 : i32, i32
  }
  func.func @transform_6(%arg0: i32) -> (i32, i32) {
    %c0_i32 = arith.constant 0 : i32
    %c0_i32_0 = arith.constant 0 : i32
    %c0_i32_1 = arith.constant 0 : i32
    return %c0_i32, %c0_i32_0 : i32, i32
  }
  func.func @transform_7(%arg0: i32) -> (i32, i32) {
    %c0_i32 = arith.constant 0 : i32
    %c0_i32_0 = arith.constant 0 : i32
    %c0_i32_1 = arith.constant 0 : i32
    return %c0_i32, %c0_i32_0 : i32, i32
  }
  func.func @transform_8(%arg0: i32) -> (i32, i32) {
    %c0_i32 = arith.constant 0 : i32
    %c0_i32_0 = arith.constant 0 : i32
    %c0_i32_1 = arith.constant 0 : i32
    return %c0_i32, %c0_i32_0 : i32, i32
  }
  func.func @transform_9(%arg0: i32) -> (i32, i32) {
    %c0_i32 = arith.constant 0 : i32
    %c0_i32_0 = arith.constant 0 : i32
    return %arg0, %c0_i32 : i32, i32
  }
}

</mosaic_0001>

<bundles_post_ra>
// kernel: bottleneck_forward.1
= control target key start
LH: loop header
LB: loop body
LE: loop exit
PB: predicated region body
PF: predicated region fallthrough
CT: control target
= control target key end

     0   :  { %s1140_s30 = smov 0   ;;  %s1323_s0 = inlined_call_operand.vmem [shape: f32[32,256], index: 0, kind: input, shape index: {}]   ;;  %s1324_s1 = inlined_call_operand.vmem [shape: bf16[256,64], index: 1, kind: input, shape index: {}]   ;;  %s1325_s2 = inlined_call_operand.vmem [shape: bf16[64,64], index: 2, kind: input, shape index: {}]   ;;  %s1326_s3 = inlined_call_operand.vmem [shape: bf16[64,64], index: 3, kind: input, shape index: {}]   ;;  %s1327_s4 = inlined_call_operand.vmem [shape: bf16[64,64], index: 4, kind: input, shape index: {}]   ;;  %s1328_s5 = inlined_call_operand.vmem [shape: bf16[64,256], index: 5, kind: input, shape index: {}]   ;;  %s1329_s6 = inlined_call_operand.vmem [shape: f32[1,64], index: 6, kind: input, shape index: {}]   ;;  %s1330_s7 = inlined_call_operand.vmem [shape: f32[1,64], index: 7, kind: input, shape index: {}]   ;;  %s1331_s8 = inlined_call_operand.vmem [shape: f32[1,256], index: 8, kind: input, shape index: {}]   ;;  %s1332_s9 = inlined_call_operand.vmem [shape: bf16[32,256], index: 9, kind: output, shape index: {}]  }
   0x1 LB: > { %s872_s10 = sadd.s32 4294967295, %s1088_s30   ;;  %p876_p0 = scmp.ge.s32.totalorder %s1088_s30, 1  ;;  %s1088_s30 = sphi %s1140_s30, %s19_s30  }
   0x2   : > { %p289_p1 = scmp.lt.s32.totalorder %s1088_s30, 3 }
   0x4   : > { %p290_p2 = pnand %p876_p0, %p289_p1 }
   0x5   : > { %s877_s23 = sshll.u32 (!%p290_p2), %s872_s10, 1 }
   0x6   : > { %293 = sbr.rel (%p290_p2) target bundleno = 498 (0x1f2), region = 56  ;;  %p328_p3 = scmp.lt.s32.totalorder (!%p290_p2), %s877_s23, 3 }
   0xb   : > { %v1043_v0 = vld [vmem:[%s1324_s1 + $0x38] sm:$0xff]  ;;  %v1042_v2 = vld [vmem:[%s1324_s1 + $0x30] sm:$0xff]  ;;  %v1041_v4 = vld [vmem:[%s1324_s1 + $0x28] sm:$0xff]  ;;  %s1334_s23 = smov (!%p328_p3, %s877_s23), 3  ;;  %v512_v38 = vlaneseq  ;;  %vm597_vm0 = vcmask 523264  }
   0xc   : > { %v1051_v1 = vld [vmem:[%s1324_s1 + $0x78] sm:$0xff]  ;;  %480 = vmatpush.bf16.msra.mxu0 %v1043_v0  ;;  %v1050_v3 = vld [vmem:[%s1324_s1 + $0x70] sm:$0xff]  ;;  %v1049_v5 = vld [vmem:[%s1324_s1 + $0x68] sm:$0xff]  ;;  %s1034_s16 = sshll.u32 %s1334_s23, 4  ;;  %s1035_s14 = sshll.u32 %s1334_s23, 3 }
   0xd   : > { %494 = vmatpush.bf16.msra.mxu1 %v1051_v1  ;;  %v1040_v6 = vld [vmem:[%s1324_s1 + $0x20] sm:$0xff]  ;;  %v1039_v8 = vld [vmem:[%s1324_s1 + $0x18] sm:$0xff]  ;;  %v1038_v10 = vld [vmem:[%s1324_s1 + $0x10] sm:$0xff]  ;;  %s332_s24 = scalar_lea.vmem %s1323_s0, %s1034_s16  ;;  %v513_v42 = vshrl.u32 %v512_v38, 7  ;;  %s339_s17 = scalar_lea.vmem %s1332_s9, %s1035_s14 }
   0xe   : > { %v1048_v7 = vld [vmem:[%s1324_s1 + $0x60] sm:$0xff]  ;;  %v1047_v9 = vld [vmem:[%s1324_s1 + $0x58] sm:$0xff]  ;;  %v1046_v11 = vld [vmem:[%s1324_s1 + $0x50] sm:$0xff] }
   0xf   : > { %v1037_v12 = vld [vmem:[%s1324_s1 + $0x8] sm:$0xff]  ;;  %v1036_v14 = vld [vmem:[%s1324_s1] sm:$0xff]  ;;  %v1204_v17 = vld [vmem:[%s332_s24 + $0x10] sm:$0xff]  ;;  %v527_v46 = vand.u32 15, %v513_v42  ;;  %vm514_vm1 = vcmp.lt.s32.totalorder %v513_v42, 1  ;;  %v522_v53 = vadd.s32 8, %v513_v42 }
  0x10   : > { %481 = vmatpush.bf16.msra.mxu0 %v1042_v2  ;;  %v1045_v13 = vld [vmem:[%s1324_s1 + $0x48] sm:$0xff]  ;;  %v1044_v15 = vld [vmem:[%s1324_s1 + $0x40] sm:$0xff]  ;;  %v1208_v19 = vld [vmem:[%s332_s24 + $0x18] sm:$0xff]  ;;  %vm519_vm3 = vcmp.lt.s32.totalorder %v513_v42, 7 }
  0x11   : > { %495 = vmatpush.bf16.msra.mxu1 %v1050_v3  ;;  %v1202_v16 = vld [vmem:[%s332_s24] sm:$0xff]  ;;  %v1206_v18 = vld [vmem:[%s332_s24 + $0x8] sm:$0xff]  ;;  %v1059_v22 = vld [vmem:[%s1326_s3 + $0x18] sm:$0xff]  ;;  %vm547_vm2 = vcmp.eq.s32.totalorder %v527_v46, 0  ;;  %v534_v57 = vand.u32 15, %v522_v53 }
  0x12   : > { %v346_v20 = vpack.c.bf16 %v1204_v17, %v1202_v16  ;;  %v347_v21 = vpack.c.bf16 %v1208_v19, %v1206_v18  ;;  %605 = vmatpush.bf16.msra.mxu2 %v1059_v22  ;;  %v1058_v23 = vld [vmem:[%s1326_s3 + $0x10] sm:$0xff]  ;;  %v1055_v24 = vld [vmem:[%s1325_s2 + $0x18] sm:$0xff]  ;;  %v1057_v25 = vld [vmem:[%s1326_s3 + $0x8] sm:$0xff] }
  0x13   : > { %646 = vmatpush.bf16.msra.mxu3 %v1055_v24  ;;  %v1054_v26 = vld [vmem:[%s1325_s2 + $0x10] sm:$0xff]  ;;  %v1056_v27 = vld [vmem:[%s1326_s3] sm:$0xff]  ;;  %v1053_v28 = vld [vmem:[%s1325_s2 + $0x8] sm:$0xff]  ;;  %vm552_vm4 = vcmp.eq.s32.totalorder %v534_v57, 15 }
  0x14   : > { %482 = vmatpush.bf16.msra.mxu0 %v1041_v4  ;;  %v1063_v29 = vld [vmem:[%s1327_s4 + $0x18] sm:$0xff]  ;;  %v1052_v30 = vld [vmem:[%s1325_s2] sm:$0xff]  ;;  %v1062_v31 = vld [vmem:[%s1327_s4 + $0x10] sm:$0xff] }
  0x15   : > { %496 = vmatpush.bf16.msra.mxu1 %v1049_v5  ;;  %v1061_v32 = vld [vmem:[%s1327_s4 + $0x8] sm:$0xff]  ;;  %v1060_v33 = vld [vmem:[%s1327_s4] sm:$0xff]  ;;  %v1024_v63 = vld [vmem:[%s1328_s5 + $0x30] sm:$0xf] }
  0x16   : > { %606 = vmatpush.bf16.msra.mxu2 %v1058_v23  ;;  %v1080_v34 = vld [vmem:[%s1329_s6] ss:$0 sm:$0xff]  ;;  %v1071_v0 = vld [vmem:[%s1328_s5 + $0x34] sm:$0xf0]  ;;  %v1070_v1 = vld [vmem:[%s1328_s5 + $0x34] sm:$0xf] }
  0x17   : > { %647 = vmatpush.bf16.msra.mxu3 %v1054_v26  ;;  %v1025_v2 = vor.u32 %v1071_v0, %v1024_v63  ;;  %v1026_v3 = vld [vmem:[%s1328_s5 + $0x38] sm:$0xf0]  ;;  %v1016_v5 = vld [vmem:[%s1328_s5 + $0x20] sm:$0xf]  ;;  %v1065_v22 = vld [vmem:[%s1328_s5 + $0x4] sm:$0xf0] }
  0x18   : > { %483 = vmatpush.bf16.msra.mxu0 %v1040_v6  ;;  %v1029_v4 = vor.u32 %v1070_v1, %v1026_v3  ;;  %v1069_v6 = vld [vmem:[%s1328_s5 + $0x24] sm:$0xf0]  ;;  %v1064_v23 = vld [vmem:[%s1328_s5 + $0x4] sm:$0xf] }
  0x19   : > { %497 = vmatpush.bf16.msra.mxu1 %v1048_v7  ;;  %v1068_v7 = vld [vmem:[%s1328_s5 + $0x24] sm:$0xf] }
  0x1a   : > { %607 = vmatpush.bf16.msra.mxu2 %v1057_v25  ;;  %v1002_v25 = vld [vmem:[%s1328_s5 + $0x8] sm:$0xf0] }
  0x1b   : > { %648 = vmatpush.bf16.msra.mxu3 %v1053_v28  ;;  %v1005_v26 = vor.u32 %v1064_v23, %v1002_v25 }
  0x1c   : > { %484 = vmatpush.bf16.msra.mxu0 %v1039_v8  ;;  %v1017_v8 = vor.u32 %v1069_v6, %v1016_v5 }
  0x1d   : > { %498 = vmatpush.bf16.msra.mxu1 %v1047_v9  ;;  %v1018_v9 = vld [vmem:[%s1328_s5 + $0x28] sm:$0xf0] }
  0x1e   : > { %608 = vmatpush.bf16.msra.mxu2 %v1056_v27 }
  0x1f   : > { %649 = vmatpush.bf16.msra.mxu3 %v1052_v30 }
  0x20   : > { %485 = vmatpush.bf16.msra.mxu0 %v1038_v10  ;;  %v1021_v10 = vor.u32 %v1068_v7, %v1018_v9 }
  0x21   : > { %499 = vmatpush.bf16.msra.mxu1 %v1046_v11  ;;  %v1008_v11 = vld [vmem:[%s1328_s5 + $0x10] sm:$0xf] }
  0x22   : > { %696 = vmatpush.bf16.msrb.mxu2 %v1063_v29 }
  0x23   : > { %778 = vmatpush.bf16.msrb.mxu3 %v1025_v2 }
  0x24   : > { %486 = vmatpush.bf16.msra.mxu0 %v1037_v12  ;;  %v1067_v12 = vld [vmem:[%s1328_s5 + $0x14] sm:$0xf0] }
  0x25   : > { %500 = vmatpush.bf16.msra.mxu1 %v1045_v13  ;;  %v1066_v13 = vld [vmem:[%s1328_s5 + $0x14] sm:$0xf] }
  0x26   : > { %697 = vmatpush.bf16.msrb.mxu2 %v1062_v31 }
  0x27   : > { %779 = vmatpush.bf16.msrb.mxu3 %v1017_v8 }
  0x28   : > { %487 = vmatpush.bf16.msra.mxu0 %v1036_v14  ;;  %v1009_v14 = vor.u32 %v1067_v12, %v1008_v11 }
  0x29   : > { %501 = vmatpush.bf16.msra.mxu1 %v1044_v15  ;;  %v1010_v15 = vld [vmem:[%s1328_s5 + $0x18] sm:$0xf0] }
  0x2a   : > { %698 = vmatpush.bf16.msrb.mxu2 %v1061_v32 }
  0x2b   : > { %488 = vmatmul.bf16.vlgmr.msra.gmra.mxu0 %v346_v20  ;;  %v1013_v20 = vor.u32 %v1066_v13, %v1010_v15  ;;  %780 = vmatpush.bf16.msrb.mxu3 %v1009_v14 }
  0x2c   : > { %502 = vmatmul.bf16.vlgmr.msra.gmra.mxu1 %v347_v21  ;;  %792 = vmatpush.bf16.msrb.mxu0 %v1029_v4  ;;  %v1000_v21 = vld [vmem:[%s1328_s5] sm:$0xf] }
  0x2d   : > { %v1001_v24 = vor.u32 %v1065_v22, %v1000_v21 }
  0x2e   : > { %699 = vmatpush.bf16.msrb.mxu2 %v1060_v33 }
  0x2f   : > { %781 = vmatpush.bf16.msrb.mxu3 %v1001_v24 }
  0x30   : > { %793 = vmatpush.bf16.msrb.mxu0 %v1021_v10 }
  0x34   : > { %794 = vmatpush.bf16.msrb.mxu0 %v1013_v20 }
  0x38   : > { %795 = vmatpush.bf16.msrb.mxu0 %v1005_v26 }
  0xa8   : > { %v489_v35 = vpop.f32.mrf.mxu0 }
  0xa9   : > { %v503_v36 = vpop.f32.mrf.mxu1  ;;  %v490_v37 = vadd.f32 %v1080_v34, %v489_v35 }
  0xab   : > { %v504_v39 = vadd.f32 %v503_v36, %v490_v37 }
  0xad   : > { %v508_v44 = vmax.f32 %v504_v39, 0.0 }
  0xaf   : > { %v510_v48 = vrot.slane %v508_v44, 7  ;;  %v517_v58 = vrot.slane %v508_v44, 1 }
  0xb0   : > { %v491_v40 = vpop.f32.mrf.mxu0 }
  0xb1   : > { %v492_v41 = vadd.f32 %v1080_v34, %v491_v40  ;;  %v505_v43 = vpop.f32.mrf.mxu1  ;;  %v1081_v34 = vld [vmem:[%s1330_s7] ss:$0 sm:$0xff] }
  0xb3   : > { %v506_v45 = vadd.f32 %v505_v43, %v492_v41  ;;  %v725_v43 = vld [vmem:[%s1331_s8] sm:$0x3] }
  0xb5   : > { %v509_v47 = vmax.f32 %v506_v45, 0.0 }
  0xb7   : > { %v511_v49 = vrot.slane %v509_v47, 7  ;;  %v564_v50 = vpack.c.bf16 %v509_v47, %v508_v44  ;;  %v518_v56 = vrot.slane %v509_v47, 1  ;;  %v728_v44 = vperm.slane %v725_v43, 1 }
  0xb8   : > { %v727_v47 = vperm.slane %v725_v43, 0 }
  0xb9   : > { %963 = vmatmul.msk.bf16.vlgmr.msra.gmra.mxu2 %vm597_vm0, %v564_v50  ;;  %v515_v51 = vsel %vm514_vm1, %v510_v48, %v511_v49  ;;  %v516_v52 = vsel %vm514_vm1, %v511_v49, %v510_v48  ;;  %v521_v59 = vsel %vm519_vm3, %v518_v56, %v517_v58  ;;  %v520_v60 = vsel %vm519_vm3, %v517_v58, %v518_v56 }
  0xba   : > { %v549_v54 = vsel %vm547_vm2, 0.0, %v516_v52  ;;  %v554_v61 = vsel %vm552_vm4, 0.0, %v521_v59 }
  0xbb   : > { %v555_v55 = vpack.c.bf16 %v515_v51, %v549_v54  ;;  %v656_v62 = vpack.c.bf16 %v554_v61, %v520_v60 }
  0xbd   : > { %980 = vmatmul.msk.bf16.vlgmr.msra.gmra.mxu3 %vm597_vm0, %v555_v55 }
  0xc9   : > { %997 = vmatmul.msk.bf16.vlgmr.msrb.gmra.mxu2 %vm597_vm0, %v656_v62 }
 0x13c   : > { %v610_v27 = vpop.f32.mrf.mxu2 }
 0x140   : > { %v651_v29 = vpop.f32.mrf.mxu3 }
 0x141   : > { %v652_v31 = vadd.f32 %v651_v29, %v610_v27 }
 0x144   : > { %v612_v28 = vpop.f32.mrf.mxu2 }
 0x148   : > { %v653_v32 = vpop.f32.mrf.mxu3 }
 0x149   : > { %v654_v35 = vadd.f32 %v653_v32, %v612_v28 }
 0x14c   : > { %v701_v30 = vpop.f32.mrf.mxu2 }
 0x14d   : > { %v706_v33 = vadd.f32 %v701_v30, %v652_v31 }
 0x14f   : > { %v712_v37 = vadd.f32 %v1081_v34, %v706_v33 }
 0x151   : > { %v714_v40 = vmax.f32 %v712_v37, 0.0 }
 0x154   : > { %v703_v36 = vpop.f32.mrf.mxu2 }
 0x155   : > { %v707_v38 = vadd.f32 %v703_v36, %v654_v35 }
 0x157   : > { %v713_v39 = vadd.f32 %v1081_v34, %v707_v38 }
 0x159   : > { %v715_v41 = vmax.f32 %v713_v39, 0.0 }
 0x15b   : > { %v716_v42 = vpack.c.bf16 %v715_v41, %v714_v40 }
 0x15d   : > { %1030 = vmatmul.msk.bf16.vlgmr.msrb.gmra.mxu3 %vm597_vm0, %v716_v42  ;;  %1031 = vmatmul.msk.bf16.vlgmr.msrb.gmra.mxu0 %vm597_vm0, %v716_v42 }
 0x1da   : > { %v797_v45 = vpop.f32.mrf.mxu0 }
 0x1db   : > { %v798_v46 = vadd.f32 %v797_v45, %v728_v44 }
 0x1dd   : > { %v803_v49 = vadd.f32 %v798_v46, %v1206_v18 }
 0x1df   : > { %v807_v53 = vmax.f32 %v803_v49, 0.0 }
 0x1e0   : > { %v783_v48 = vpop.f32.mrf.mxu3 }
 0x1e1   : > { %v784_v50 = vadd.f32 %v783_v48, %v727_v47 }
 0x1e2   : > { %v799_v51 = vpop.f32.mrf.mxu0 }
 0x1e3   : > { %v802_v52 = vadd.f32 %v784_v50, %v1202_v16  ;;  %v800_v55 = vadd.f32 %v799_v51, %v728_v44 }
 0x1e5   : > { %v806_v54 = vmax.f32 %v802_v52, 0.0  ;;  %v805_v58 = vadd.f32 %v800_v55, %v1208_v19 }
 0x1e7   : > { %v810_v56 = vpack.c.bf16 %v807_v53, %v806_v54  ;;  %v809_v60 = vmax.f32 %v805_v58, 0.0 }
 0x1e8   : > { %v785_v57 = vpop.f32.mrf.mxu3 }
 0x1e9   : > { %812 = vst [vmem:[%s339_s17] sm:$0xff] %v810_v56  ;;  %v786_v59 = vadd.f32 %v785_v57, %v727_v47 }
 0x1eb   : > { %v804_v18 = vadd.f32 %v786_v59, %v1204_v17 }
 0x1ed   : > { %v808_v61 = vmax.f32 %v804_v18, 0.0 }
 0x1ef   : > { %v811_v62 = vpack.c.bf16 %v809_v60, %v808_v61 }
 0x1f1   : > { %813 = vst [vmem:[%s339_s17 + $0x8] sm:$0xff] %v811_v62 }
 0x1f2 PF: > { %s19_s30 = sadd.s32 1, %s1088_s30  }
 0x1f3   : > { %p16_p4 = scmp.ge.s32.totalorder %s19_s30, 4  }
 0x1f5   :  { %18 = sbr.rel (!%p16_p4) target bundleno = 1 (0x1), region = 86 }

</bundles_post_ra>
